<compile_context>
chip_gen: v7x
topology: tpu7x:2x2x1
jax: 0.10.0
libtpu: 0.0.40
codegen_flags: <defaults>
</compile_context>

<pallas_src>
import functools

import jax
import jax.numpy as jnp
from jax.experimental import pallas as pl
from jax.experimental.pallas import tpu as pltpu


# --------------------------------------------------------------------------
# Fused kernel: 1x1 conv -> ReLU -> fc -> L2 normalize
# --------------------------------------------------------------------------
def _subnet_kernel(x_ref, cw_ref, cb_ref, fw_ref, fb_ref, o_ref, *, n_ch):
    """subNet forward on one fused tile.

    x:  (B, C, P) VMEM     cw: (1, C) SMEM      cb: (1, 1) SMEM
    fw: (P, 128)  VMEM     fb: (1, 128) VMEM    o:  (B, 128) VMEM
    """
    x = x_ref[...]                                       # (B, C, P)

    # --- 1x1 conv (C -> 1) + bias + ReLU on the VPU (scalar weights in SMEM) ---
    y = cw_ref[0, 0] * x[:, 0, :]                        # (B, P)
    for c in range(1, n_ch):                             # static unroll, C is tiny
        y = y + cw_ref[0, c] * x[:, c, :]
    y = jnp.maximum(y + cb_ref[0, 0], 0.0)               # == flattened conv output

    # --- fc: (B, P) @ (P, 128) + b   (MXU, lane-dense N=128) ---
    h = jnp.dot(y, fw_ref[...], preferred_element_type=jnp.float32) + fb_ref[...]

    # --- F.normalize(p=2, dim=1, eps=1e-12) ---
    nrm = jnp.sqrt(jnp.sum(h * h, axis=-1, keepdims=True))   # (B, 1)
    o_ref[...] = h / jnp.maximum(nrm, 1e-12)


# --------------------------------------------------------------------------
# Wrapper: layout plumbing + pallas_call
# --------------------------------------------------------------------------
def _subnet_apply(x, conv_w, conv_b, fc_w, fc_b):
    B, C, H, W = x.shape
    P = H * W
    out_dim = fc_w.shape[0]

    x3 = x.reshape(B, C, P)             # channels on sublanes, spatial on lanes
    cw = conv_w.reshape(1, C)           # torch Conv2d weight (1, C, 1, 1) -> scalars
    cb = conv_b.reshape(1, 1)
    fw = fc_w.T                         # torch Linear weight (128, P) -> (P, 128)
    fb = fc_b.reshape(1, out_dim)

    kernel = functools.partial(_subnet_kernel, n_ch=C)
    return pl.pallas_call(
        kernel,
        out_shape=jax.ShapeDtypeStruct((B, out_dim), jnp.float32),
        in_specs=[
            pl.BlockSpec(memory_space=pltpu.MemorySpace.VMEM),   # x
            pl.BlockSpec(memory_space=pltpu.MemorySpace.SMEM),   # conv weight (scalars)
            pl.BlockSpec(memory_space=pltpu.MemorySpace.SMEM),   # conv bias   (scalar)
            pl.BlockSpec(memory_space=pltpu.MemorySpace.VMEM),   # fc weight (P, 128)
            pl.BlockSpec(memory_space=pltpu.MemorySpace.VMEM),   # fc bias   (1, 128)
        ],
        out_specs=pl.BlockSpec(memory_space=pltpu.MemorySpace.VMEM),
    )(x3, cw, cb, fw, fb)


@jax.jit
def subnet_forward(params, x):
    """subNet.forward: shape-dispatched fc, matching the torch branches."""
    _, _, H, W = x.shape
    P = H * W
    if P == 14 * 14:
        fc_w, fc_b = params["fc1_w"], params["fc1_b"]
    elif P == 7 * 7:
        fc_w, fc_b = params["fc2_w"], params["fc2_b"]
    else:
        raise NotImplementedError
    return _subnet_apply(x, params["conv_w"], params["conv_b"], fc_w, fc_b)


# --------------------------------------------------------------------------
# Main
# --------------------------------------------------------------------------
if __name__ == "__main__":
    IN_DIM = 4
    B = 2

    keys = jax.random.split(jax.random.PRNGKey(0), 7)
    params = {
        # nn.Conv2d(in_dim, 1, kernel_size=1)
        "conv_w": 0.1 * jax.random.normal(keys[0], (1, IN_DIM, 1, 1), jnp.float32),
        "conv_b": 0.1 * jax.random.normal(keys[1], (1,), jnp.float32),
        # nn.Linear(14*14, 128)
        "fc1_w": 0.1 * jax.random.normal(keys[2], (128, 14 * 14), jnp.float32),
        "fc1_b": 0.1 * jax.random.normal(keys[3], (128,), jnp.float32),
        # nn.Linear(7*7, 128)
        "fc2_w": 0.1 * jax.random.normal(keys[4], (128, 7 * 7), jnp.float32),
        "fc2_b": 0.1 * jax.random.normal(keys[5], (128,), jnp.float32),
    }

    # 14x14 input exercises the fc1 branch; a strided view gives the 7x7 branch.
    x14 = jax.random.normal(keys[6], (B, IN_DIM, 14, 14), jnp.float32)
    x7 = x14[:, :, ::2, ::2]

    out14 = jax.block_until_ready(subnet_forward(params, x14))
    out7 = jax.block_until_ready(subnet_forward(params, x7))

    assert out14.shape == (B, 128) and out7.shape == (B, 128)
    assert bool(jnp.all(jnp.isfinite(out14))) and bool(jnp.all(jnp.isfinite(out7)))
    # F.normalize => unit L2 norm per row
    assert jnp.allclose(jnp.linalg.norm(out14, axis=1), 1.0, atol=1e-3)
    assert jnp.allclose(jnp.linalg.norm(out7, axis=1), 1.0, atol=1e-3)
    print("KERNEL_OK")
</pallas_src>

<mosaic_0001>
module attributes {stable_mosaic.version = 11 : i64} {
  func.func @_subnet_kernel(%arg0: memref<2x4x196xf32, #tpu.memory_space<vmem>>, %arg1: memref<1x4xf32, #tpu.memory_space<smem>>, %arg2: memref<1x1xf32, #tpu.memory_space<smem>>, %arg3: memref<196x128xf32, #tpu.memory_space<vmem>>, %arg4: memref<1x128xf32, #tpu.memory_space<vmem>>, %arg5: memref<2x128xf32, #tpu.memory_space<vmem>>) attributes {dimension_semantics = [], scalar_prefetch = 0 : i64, scratch_operands = 0 : i64, tpu.core_type = #tpu.core_type<tc>} {
    %c0 = arith.constant 0 : index
    %c0_0 = arith.constant 0 : index
    %c0_1 = arith.constant 0 : index
    %0 = vector.load %arg0[%c0, %c0_0, %c0_1] : memref<2x4x196xf32, #tpu.memory_space<vmem>>, vector<2x4x196xf32>
    %c0_2 = arith.constant 0 : index
    %c0_3 = arith.constant 0 : index
    %1 = memref.load %arg1[%c0_2, %c0_3] : memref<1x4xf32, #tpu.memory_space<smem>>
    %2 = vector.extract_strided_slice %0 {offsets = [0, 0, 0], sizes = [2, 1, 196], strides = [1, 1, 1]} : vector<2x4x196xf32> to vector<2x1x196xf32>
    %3 = vector.shape_cast %2 : vector<2x1x196xf32> to vector<2x196xf32>
    %4 = vector.broadcast %1 : f32 to vector<2x196xf32>
    %5 = arith.mulf %4, %3 : vector<2x196xf32>
    %c0_4 = arith.constant 0 : index
    %c1 = arith.constant 1 : index
    %6 = memref.load %arg1[%c0_4, %c1] : memref<1x4xf32, #tpu.memory_space<smem>>
    %7 = vector.extract_strided_slice %0 {offsets = [0, 1, 0], sizes = [2, 1, 196], strides = [1, 1, 1]} : vector<2x4x196xf32> to vector<2x1x196xf32>
    %8 = vector.shape_cast %7 : vector<2x1x196xf32> to vector<2x196xf32>
    %9 = vector.broadcast %6 : f32 to vector<2x196xf32>
    %10 = arith.mulf %9, %8 : vector<2x196xf32>
    %11 = arith.addf %5, %10 : vector<2x196xf32>
    %c0_5 = arith.constant 0 : index
    %c2 = arith.constant 2 : index
    %12 = memref.load %arg1[%c0_5, %c2] : memref<1x4xf32, #tpu.memory_space<smem>>
    %13 = vector.extract_strided_slice %0 {offsets = [0, 2, 0], sizes = [2, 1, 196], strides = [1, 1, 1]} : vector<2x4x196xf32> to vector<2x1x196xf32>
    %14 = vector.shape_cast %13 : vector<2x1x196xf32> to vector<2x196xf32>
    %15 = vector.broadcast %12 : f32 to vector<2x196xf32>
    %16 = arith.mulf %15, %14 : vector<2x196xf32>
    %17 = arith.addf %11, %16 : vector<2x196xf32>
    %c0_6 = arith.constant 0 : index
    %c3 = arith.constant 3 : index
    %18 = memref.load %arg1[%c0_6, %c3] : memref<1x4xf32, #tpu.memory_space<smem>>
    %19 = vector.extract_strided_slice %0 {offsets = [0, 3, 0], sizes = [2, 1, 196], strides = [1, 1, 1]} : vector<2x4x196xf32> to vector<2x1x196xf32>
    %20 = vector.shape_cast %19 : vector<2x1x196xf32> to vector<2x196xf32>
    %21 = vector.broadcast %18 : f32 to vector<2x196xf32>
    %22 = arith.mulf %21, %20 : vector<2x196xf32>
    %23 = arith.addf %17, %22 : vector<2x196xf32>
    %c0_7 = arith.constant 0 : index
    %c0_8 = arith.constant 0 : index
    %24 = memref.load %arg2[%c0_7, %c0_8] : memref<1x1xf32, #tpu.memory_space<smem>>
    %25 = vector.broadcast %24 : f32 to vector<2x196xf32>
    %26 = arith.addf %23, %25 : vector<2x196xf32>
    %cst = arith.constant 0.000000e+00 : f32
    %27 = vector.broadcast %cst : f32 to vector<2x196xf32>
    %28 = arith.maximumf %26, %27 : vector<2x196xf32>
    %c0_9 = arith.constant 0 : index
    %c0_10 = arith.constant 0 : index
    %29 = vector.load %arg3[%c0_9, %c0_10] : memref<196x128xf32, #tpu.memory_space<vmem>>, vector<196x128xf32>
    %cst_11 = arith.constant dense<0.000000e+00> : vector<2x128xf32>
    %30 = tpu.matmul %28, %29, %cst_11 {dimension_numbers = #tpu.dot_dimension_numbers<[1], [0], [0], [1], [0, 0, 1, 1], [], []>} : vector<2x196xf32>, vector<196x128xf32>, vector<2x128xf32> -> vector<2x128xf32>
    %c0_12 = arith.constant 0 : index
    %c0_13 = arith.constant 0 : index
    %31 = vector.load %arg4[%c0_12, %c0_13] : memref<1x128xf32, #tpu.memory_space<vmem>>, vector<1x128xf32>
    %32 = vector.broadcast %31 : vector<1x128xf32> to vector<2x128xf32>
    %33 = arith.addf %30, %32 : vector<2x128xf32>
    %34 = arith.mulf %33, %33 : vector<2x128xf32>
    %cst_14 = arith.constant dense<0.000000e+00> : vector<2xf32>
    %35 = vector.multi_reduction <add>, %34, %cst_14 [1] : vector<2x128xf32> to vector<2xf32>
    %36 = vector.shape_cast %35 : vector<2xf32> to vector<2x1xf32>
    %37 = math.sqrt %36 : vector<2x1xf32>
    %cst_15 = arith.constant 9.99999996E-13 : f32
    %38 = vector.broadcast %cst_15 : f32 to vector<2x1xf32>
    %39 = arith.maximumf %37, %38 : vector<2x1xf32>
    %40 = vector.broadcast %39 : vector<2x1xf32> to vector<2x128xf32>
    %41 = arith.divf %33, %40 : vector<2x128xf32>
    %c0_16 = arith.constant 0 : index
    %c0_17 = arith.constant 0 : index
    %42 = vector.load %arg5[%c0_16, %c0_17] : memref<2x128xf32, #tpu.memory_space<vmem>>, vector<2x128xf32>
    tpu.vector_store %arg5[%c0_16, %c0_17], %41 {strides = array<i32>} : memref<2x128xf32, #tpu.memory_space<vmem>>, vector<2x128xf32>,
    return
  }
}

</mosaic_0001>

<bundles_post_ra>
// kernel: subnet_forward.1
= control target key start
LH: loop header
LB: loop body
LE: loop exit
PB: predicated region body
PF: predicated region fallthrough
CT: control target
= control target key end

     0   :  { %11 = vsyncpa [#allocation5], 0  ;;  %s495_s0 = inlined_call_operand.vmem [shape: f32[2,4,196], index: 0, kind: input, shape index: {}]   ;;  %s496_s1 = inlined_call_operand.vmem [shape: f32[1,4], index: 1, kind: input, shape index: {}]   ;;  %s497_s2 = inlined_call_operand.<no memory space> [shape: f32[1,1], index: 2, kind: input, shape index: {}]   ;;  %s498_s3 = inlined_call_operand.vmem [shape: f32[196,128], index: 3, kind: input, shape index: {}]   ;;  %s499_s4 = inlined_call_operand.vmem [shape: f32[1,128], index: 4, kind: input, shape index: {}]   ;;  %s500_s5 = inlined_call_operand.hbm [shape: f32[2,128], index: 5, kind: output, shape index: {}]  }
   0x1   :  { %12 = vsyncpa [#allocation4], 0  ;;  %s21_s20 = sshll.u32 %s496_s1, 4  ;;  %s22_s20 = int_to_ptr.vmem [resolvable:$true] %s21_s20 }
   0x2   :  { %s307_s21 = scalar_lea.vmem %s22_s20, 16  ;;  %p312_p1 = scmp.lt.s32.totalorder %s22_s20, %s22_s20 }
   0x3   :  { %p308_p0 = scmp.ne.s32.totalorder %s22_s20, %s307_s21  ;;  %p313_p2 = scmp.lt.s32.totalorder %s307_s21, %s307_s21 }
   0x5   :  { %p314_p3 = por %p313_p2, %p312_p1 }
   0x7   :  { %p315_p4 = pnand %p314_p3, %p308_p0 }
   0x9   :  { %318 = shalt.err (!%p315_p4)
}
   0xa   :  { %s345_s22 = smov [#allocation3]  }
   0xb   :  { %24 = dma.vmem_to_smem %s22_s20, 16, %s345_s22, [#allocation5]  }
   0xc   :  { %341 = dma.done.wait [#allocation5], 16  }
   0xd   :  { %342 = vsyncadd [#allocation5], 4294967280 }
   0xe   :  { %34 = sfence }
   0xf   :  { %v89_v0 = vld [vmem:[%s498_s3] sm:$0xff]  ;;  %v90_v1 = vld [vmem:[%s498_s3 + $0x8] sm:$0xff]  ;;  %v91_v2 = vld [vmem:[%s498_s3 + $0x10] sm:$0xff]  ;;  %v346_v3 = vmov 0.0|0.0   ;;  %s37_s30 = sld [smem:[#allocation3]]  ;;  %s251_s6 = sld [smem:[#allocation3 + $0x1]]  ;;  %v123_v23 = vlaneseq  ;;  %v84_v44 = vstv %s497_s2 }
  0x10   :  { %263 = vmatprep.subr.bf16.mxu0 %v346_v3  ;;  %v264_v4 = vpack.c.bf16 %v90_v1, %v89_v0  ;;  %v92_v5 = vld [vmem:[%s498_s3 + $0x18] sm:$0xff]  ;;  %s254_s7 = sld [smem:[#allocation3 + $0x2]]  ;;  %v93_v7 = vld [vmem:[%s498_s3 + $0x20] sm:$0xff]  ;;  %v94_v8 = vld [vmem:[%s498_s3 + $0x28] sm:$0xff]  ;;  %s257_s12 = sld [smem:[#allocation3 + $0x3]]  ;;  %vm139_vm0 = vcmask 1041409  }
  0x11   :  { %v267_v6 = vpack.c.bf16 %v92_v5, %v91_v2  ;;  %v270_v9 = vpack.c.bf16 %v94_v8, %v93_v7  ;;  %v95_v10 = vld [vmem:[%s498_s3 + $0x30] sm:$0xff]  ;;  %v96_v11 = vld [vmem:[%s498_s3 + $0x38] sm:$0xff]  ;;  %v35_v13 = vld [vmem:[%s495_s0] sm:$0xff]  ;;  %v124_v41 = vshrl.u32 %v123_v23, 7  ;;  %vm143_vm1 = vcmask 556032  }
  0x12   :  { %265 = vmatpush1.bf16.msra.mxu0 %v264_v4  ;;  %v36_v14 = vld [vmem:[%s495_s0 + $0x8] sm:$0xff]  ;;  %v273_v20 = vpack.c.bf16 %v96_v11, %v95_v10  ;;  %v97_v28 = vld [vmem:[%s498_s3 + $0x40] sm:$0xff]  ;;  %v99_v42 = vld [vmem:[%s498_s3 + $0x50] sm:$0xff]  ;;  %vm146_vm2 = vcmask 1043456   ;;  %vm221_vm3 = vcmask 1041408  }
  0x13   :  { %266 = vmatprep.subr.bf16.mxu0 %v346_v3  ;;  %v98_v29 = vld [vmem:[%s498_s3 + $0x48] sm:$0xff]  ;;  %v100_v43 = vld [vmem:[%s498_s3 + $0x58] sm:$0xff]  ;;  %v129_v50 = vsub.s32 4, %v124_v41  ;;  %v101_v51 = vld [vmem:[%s498_s3 + $0x60] sm:$0xff]  ;;  %v125_v10 = vsub.s32 0, %v124_v41 }
  0x14   :  { %v276_v38 = vpack.c.bf16 %v98_v29, %v97_v28  ;;  %v279_v47 = vpack.c.bf16 %v100_v43, %v99_v42  ;;  %v102_v52 = vld [vmem:[%s498_s3 + $0x68] sm:$0xff]  ;;  %v103_v58 = vld [vmem:[%s498_s3 + $0x70] sm:$0xff]  ;;  %v104_v59 = vld [vmem:[%s498_s3 + $0x78] sm:$0xff] }
  0x15   :  { %v38_v12 = vstv %s37_s30  ;;  %v42_v15 = vstv %s251_s6  ;;  %v282_v55 = vpack.c.bf16 %v102_v52, %v101_v51  ;;  %v285_v61 = vpack.c.bf16 %v104_v59, %v103_v58  ;;  %v105_v62 = vld [vmem:[%s498_s3 + $0x80] sm:$0xff]  ;;  %v106_v63 = vld [vmem:[%s498_s3 + $0x88] sm:$0xff] }
  0x16   :  { %268 = vmatpush1.bf16.msra.mxu0 %v267_v6  ;;  %v39_v16 = vmul.f32 %v38_v12, %v35_v13  ;;  %v40_v17 = vmul.f32 %v38_v12, %v36_v14  ;;  %v43_v18 = vmul.f32 %v42_v15, %v35_v13  ;;  %v44_v19 = vmul.f32 %v42_v15, %v36_v14  ;;  %v107_v1 = vld [vmem:[%s498_s3 + $0x90] sm:$0xff]  ;;  %v108_v2 = vld [vmem:[%s498_s3 + $0x98] sm:$0xff]  ;;  %v109_v5 = vld [vmem:[%s498_s3 + $0xa0] sm:$0xff] }
  0x17   :  { %269 = vmatprep.subr.bf16.mxu0 %v346_v3  ;;  %v56_v21 = vstv %s254_s7  ;;  %v70_v22 = vstv %s257_s12  ;;  %v288_v0 = vpack.c.bf16 %v106_v63, %v105_v62  ;;  %v291_v4 = vpack.c.bf16 %v108_v2, %v107_v1  ;;  %v110_v6 = vld [vmem:[%s498_s3 + $0xa8] sm:$0xff]  ;;  %v111_v8 = vld [vmem:[%s498_s3 + $0xb0] sm:$0xff] }
  0x18   :  { %v252_v24 = vrot.slane %v43_v18, 9  ;;  %v253_v25 = vrot.slane %v44_v19, 9  ;;  %v57_v26 = vmul.f32 %v56_v21, %v35_v13  ;;  %v58_v27 = vmul.f32 %v56_v21, %v36_v14  ;;  %v113_v15 = vld [vmem:[%s498_s3 + $0xc0] sm:$0xf] }
  0x19   :  { %v71_v30 = vmul.f32 %v70_v22, %v35_v13  ;;  %v72_v31 = vmul.f32 %v70_v22, %v36_v14  ;;  %v294_v7 = vpack.c.bf16 %v110_v6, %v109_v5  ;;  %v347_v14 = vmov 0.0  }
  0x1a   :  { %271 = vmatpush1.bf16.msra.mxu0 %v270_v9  ;;  %v53_v32 = vadd.f32 %v252_v24, %v39_v16  ;;  %v54_v33 = vadd.f32 %v253_v25, %v40_v17  ;;  %v255_v34 = vrot.slane %v57_v26, 10  ;;  %v256_v35 = vrot.slane %v58_v27, 10  ;;  %v112_v9 = vld [vmem:[%s498_s3 + $0xb8] sm:$0xff]  ;;  %v260_v17 = vld [vmem:[%s499_s4] ss:$0 sm:$0xff]  ;;  %s348_s3 = smov [#allocation6]  }
  0x1b   :  { %272 = vmatprep.subr.bf16.mxu0 %v346_v3  ;;  %v258_v36 = vrot.slane %v71_v30, 11  ;;  %v259_v37 = vrot.slane %v72_v31, 11  ;;  %v297_v11 = vpack.c.bf16 %v112_v9, %v111_v8  ;;  %s242_s4 = sshll.u32 %s348_s3, 4  ;;  %s243_s4 = int_to_ptr.vmem [resolvable:$true] %s242_s4 }
  0x1c   :  { %v67_v39 = vadd.f32 %v255_v34, %v53_v32  ;;  %v68_v40 = vadd.f32 %v256_v35, %v54_v33  ;;  %s319_s29 = scalar_lea.vmem %s243_s4, 32  ;;  %p324_p6 = scmp.lt.s32.totalorder %s243_s4, %s243_s4 }
  0x1d   :  { %p320_p5 = scmp.ne.s32.totalorder %s243_s4, %s319_s29  ;;  %p325_p7 = scmp.lt.s32.totalorder %s319_s29, %s319_s29 }
  0x1e   :  { %274 = vmatpush1.bf16.msra.mxu0 %v273_v20  ;;  %v81_v45 = vadd.f32 %v258_v36, %v67_v39  ;;  %v82_v46 = vadd.f32 %v259_v37, %v68_v40 }
  0x1f   :  { %275 = vmatprep.subr.bf16.mxu0 %v346_v3  ;;  %p326_p8 = por %p325_p7, %p324_p6 }
  0x20   :  { %v85_v48 = vadd.f32 %v84_v44, %v81_v45  ;;  %v86_v49 = vadd.f32 %v84_v44, %v82_v46 }
  0x21   :  { %p327_p9 = pnand %p326_p8, %p320_p5 }
  0x22   :  { %277 = vmatpush1.bf16.msra.mxu0 %v276_v38  ;;  %v87_v53 = vmax.f32 %v85_v48, 0.0  ;;  %v88_v54 = vmax.f32 %v86_v49, 0.0 }
  0x23   :  { %278 = vmatprep.subr.bf16.mxu0 %v346_v3 }
  0x24   :  { %v130_v56 = vrot.slane %v87_v53, %v129_v50  ;;  %v138_v57 = vrot.slane %v88_v54, %v129_v50  ;;  %v126_v12 = vrot.slane %v87_v53, %v125_v10  ;;  %v134_v13 = vrot.slane %v88_v54, %v125_v10 }
  0x26   :  { %280 = vmatpush1.bf16.msra.mxu0 %v279_v47  ;;  %v141_v60 = vsel %vm139_vm0, %v138_v57, %v130_v56  ;;  %v140_v16 = vsel %vm139_vm0, %v134_v13, %v126_v12 }
  0x27   :  { %281 = vmatprep.subr.bf16.mxu0 %v346_v3  ;;  %262 = vmatprep.mubr.msk.f32.mxu0 %vm143_vm1, %v141_v60 }
  0x2a   :  { %283 = vmatpush1.bf16.msra.mxu0 %v282_v55 }
  0x2b   :  { %284 = vmatprep.subr.bf16.mxu0 %v346_v3 }
  0x2e   :  { %286 = vmatpush1.bf16.msra.mxu0 %v285_v61 }
  0x2f   :  { %287 = vmatprep.subr.bf16.mxu0 %v346_v3 }
  0x32   :  { %289 = vmatpush1.bf16.msra.mxu0 %v288_v0 }
  0x33   :  { %290 = vmatprep.subr.bf16.mxu0 %v346_v3 }
  0x36   :  { %292 = vmatpush1.bf16.msra.mxu0 %v291_v4 }
  0x37   :  { %293 = vmatprep.subr.bf16.mxu0 %v346_v3 }
  0x3a   :  { %295 = vmatpush1.bf16.msra.mxu0 %v294_v7 }
  0x3b   :  { %296 = vmatprep.subr.bf16.mxu0 %v346_v3 }
  0x3e   :  { %298 = vmatpush1.bf16.msra.mxu0 %v297_v11 }
  0x3f   :  { %198 = vmatprep.subr.mxu0 %v347_v14 }
  0x42   :  { %261 = vmatpush1.msk.msra.mxu0 %vm146_vm2, %v113_v15 }
  0x43   :  { %215 = vmatmul.mubr.f32.vlgmr.msra.gmra.mrb[0].mxu0 %v140_v16 }
 0x116   :  { %v216_v18 = vpop.f32.mrb[0].mxu0 }
 0x117   :  { %v217_v3 = vadd.f32 %v260_v17, %v216_v18  ;;  %v218_v19 = vpop.f32.mrb[1].mxu0 }
 0x119   :  { %v220_v20 = vmul.f32 %v217_v3, %v217_v3 }
 0x11b   :  { %v222_v21 = vsel %vm221_vm3, %v220_v20, 0.0 }
 0x11c   :  { %223 = vadd.xlane.f32.xlu0 %v222_v21 }
 0x1a9   :  { %v224_v22 = vpop.xlane.xlu0 %223 }
 0x1aa   :  { %303 = vrsqrt.f32 %v224_v22  ;;  %vm227_vm4 = vcmp.eq.f32.partialorder %v224_v22, inf  ;;  %v230_v25 = vand.u32 2147483648, %v224_v22  ;;  %vm229_vm5 = vcmp.eq.f32.partialorder %v224_v22, 0.0 }
 0x1b4   :  { %v304_v23 = vpop.eup %303 }
 0x1b5   :  { %v226_v24 = vmul.f32 %v304_v23, %v224_v22 }
 0x1b7   :  { %v228_v26 = vsel %vm227_vm4, %v224_v22, %v226_v24 }
 0x1b8   :  { %v231_v27 = vsel %vm229_vm5, %v230_v25, %v228_v26 }
 0x1b9   :  { %v232_v28 = vmax.f32 %v231_v27, 1e-12 }
 0x1bb   :  { %305 = vrcp.f32 %v232_v28 }
 0x1c5   :  { %v306_v29 = vpop.eup %305 }
 0x1c6   :  { %v234_v30 = vmul.f32 %v306_v29, %v217_v3 }
 0x1c8   :  { %235 = vst [vmem:[#allocation6] sm:$0x3] %v234_v30 }
 0x1c9   :  { %330 = shalt.err (!%p327_p9)
}
 0x1ca   :  { %s331_s7 = scalar_lea.hbm %s500_s5, 32 }
 0x1cb   :  { %p332_p10 = scmp.ne.s32.totalorder %s500_s5, %s331_s7  ;;  %p335_p11 = scmp.lt.u32.totalorder %s331_s7, %s500_s5 }
 0x1cd   :  { %p337_p12 = pnand %p335_p11, %p332_p10 }
 0x1cf   :  { %340 = shalt.err (!%p337_p12)
}
 0x1d0   :  { %245 = dma.vmem_to_hbm [thread:$0]  %s243_s4, 32, %s500_s5, [#allocation4]  }
 0x1d1   :  { %343 = dma.done.wait [#allocation4], 32  }
 0x1d2   :  { %344 = vsyncadd [#allocation4], 4294967264 }
 0x1d3   :  { %249 = vsyncpa [#allocation4], 1 }
 0x1d4   :  { %250 = vsyncpa [#allocation5], 1 }

</bundles_post_ra>
